<compile_context>
chip_gen: v7x
topology: tpu7x:2x2x1
jax: 0.10.0
libtpu: 0.0.40
codegen_flags: <defaults>
</compile_context>

<pallas_src>
import math
import functools

import jax
import jax.numpy as jnp
from jax.experimental import pallas as pl
from jax.experimental.pallas import tpu as pltpu


_NEG_INF = -1e30   # large finite negative: avoids inf - inf -> NaN on masked rows
_LANE = 128


def _round_up(x, m):
    return ((x + m - 1) // m) * m


def _pick_tile(n, candidates=(256, 128)):
    """Largest MXU-shaped candidate dividing n (full-extent fallback for small dims)."""
    for c in candidates:
        if n % c == 0:
            return c
    return n


def _vmem_limit(est_bytes):
    """Explicit scoped-VMEM limit: generous headroom over the estimated working
    set, clamped to a range that is safe on every generation (v7x: 64 MiB phys)."""
    return int(min(48 * 1024 * 1024, max(16 * 1024 * 1024, 2 * est_bytes)))


def _exp_dtype_for_device():
    """bf16 exp on v6e/v7x (bf16 EUP ~2x throughput); f32 on v5e and older."""
    try:
        kind = jax.devices()[0].device_kind.lower()
    except Exception:
        return jnp.float32
    if any(v in kind for v in ("v2", "v3", "v4", "v5")):
        return jnp.float32
    return jnp.bfloat16


# ---------------------------------------------------------------------------
# Kernel 1 & 3: tiled GEMM with bias  (used for QKV projection and out proj)
# ---------------------------------------------------------------------------
def _gemm_bias_kernel(x_ref, w_ref, b_ref, o_ref, acc_ref):
    kk = pl.program_id(2)

    @pl.when(kk == 0)
    def _init():
        acc_ref[...] = jnp.zeros_like(acc_ref)

    acc_ref[...] += jnp.dot(x_ref[...], w_ref[...],
                            preferred_element_type=jnp.float32)

    @pl.when(kk == pl.num_programs(2) - 1)
    def _finalize():
        o_ref[...] = (acc_ref[...] + b_ref[...]).astype(o_ref.dtype)


def _gemm_bias(x2, w, b2, out_dtype):
    """x2: (M, K) bf16, w: (K, N) bf16, b2: (1, N) f32  ->  (M, N) out_dtype."""
    M, K = x2.shape
    N = w.shape[1]
    tm = _pick_tile(M)
    tn = _pick_tile(N)
    tkc = _pick_tile(K)
    est = (2 * (tm * tkc + tkc * tn) * 2          # double-buffered x, w (bf16)
           + 2 * tn * 4                            # bias
           + tm * tn * 4                           # f32 accumulator
           + 2 * tm * tn * jnp.dtype(out_dtype).itemsize)
    return pl.pallas_call(
        _gemm_bias_kernel,
        out_shape=jax.ShapeDtypeStruct((M, N), out_dtype),
        grid_spec=pltpu.PrefetchScalarGridSpec(
            num_scalar_prefetch=0,
            grid=(M // tm, N // tn, K // tkc),
            in_specs=[
                pl.BlockSpec((tm, tkc), lambda i, j, k: (i, k)),
                pl.BlockSpec((tkc, tn), lambda i, j, k: (k, j)),
                pl.BlockSpec((1, tn), lambda i, j, k: (0, j)),
            ],
            out_specs=pl.BlockSpec((tm, tn), lambda i, j, k: (i, j)),
            scratch_shapes=[pltpu.VMEM((tm, tn), jnp.float32)],
        ),
        compiler_params=pltpu.CompilerParams(
            dimension_semantics=("parallel", "parallel", "arbitrary"),
            vmem_limit_bytes=_vmem_limit(est)),
    )(x2, w, b2)


# ---------------------------------------------------------------------------
# Kernel 2: flash attention (online softmax), heads on the grid
# ---------------------------------------------------------------------------
def _flash_attn_kernel(q_ref, kt_ref, v_ref, o_ref, m_sc, l_sc, acc_sc, *,
                       tq, tk, hd, t_valid, is_causal, padded, exp_dtype):
    qi = pl.program_id(1)
    ki = pl.program_id(2)
    nk = pl.num_programs(2)

    @pl.when(ki == 0)
    def _init():
        m_sc[...] = jnp.full(m_sc.shape, _NEG_INF, jnp.float32)
        l_sc[...] = jnp.zeros(l_sc.shape, jnp.float32)
        acc_sc[...] = jnp.zeros(acc_sc.shape, jnp.float32)

    q_start = qi * tq
    k_start = ki * tk

    def _attend(apply_mask):
        q = q_ref[0]                 # (tq, hd)    bf16 (Q pre-scaled by 1/sqrt(hd))
        kt = kt_ref[0]               # (hd, tk)    bf16 (pre-transposed K)
        v = v_ref[0]                 # (tk, hd+1)  bf16, last column == 1
        s = jnp.dot(q, kt, preferred_element_type=jnp.float32)        # (tq, tk)
        if apply_mask:
            row = q_start + jax.lax.broadcasted_iota(jnp.int32, (tq, tk), 0)
            col = k_start + jax.lax.broadcasted_iota(jnp.int32, (tq, tk), 1)
            keep = (col <= row) if is_causal else (col < t_valid)
            s = jnp.where(keep, s, _NEG_INF)
        m_prev = m_sc[...]
        m_new = jnp.maximum(m_prev, jnp.max(s, axis=-1, keepdims=True))
        alpha = jnp.exp(m_prev - m_new)                                 # f32 (tq, 1)
        p = jnp.exp((s - m_new).astype(exp_dtype))                      # bf16 on v6e/v7x
        # Fused [P @ V | rowsum(P)] in a single MXU op (ones column on V).
        pv = jnp.dot(p.astype(v.dtype), v, preferred_element_type=jnp.float32)
        l_sc[...] = alpha * l_sc[...] + pv[:, hd:hd + 1]
        acc_sc[...] = alpha * acc_sc[...] + pv[:, :hd]
        m_sc[...] = m_new

    if is_causal:
        live = k_start <= q_start + (tq - 1)          # tile has >= 1 valid key
        straddle = (k_start + (tk - 1)) > q_start     # tile crosses the diagonal
        # Padded keys need no extra mask here: for valid query rows (row < T)
        # they always lie above the diagonal; padded query rows are sliced off.

        @pl.when(jnp.logical_and(live, straddle))
        def _diag_tile():
            _attend(True)

        @pl.when(jnp.logical_and(live, jnp.logical_not(straddle)))
        def _full_tile():
            _attend(False)
    elif padded:
        pad_in_tile = (k_start + tk) > t_valid

        @pl.when(pad_in_tile)
        def _masked_tile():
            _attend(True)

        @pl.when(jnp.logical_not(pad_in_tile))
        def _clean_tile():
            _attend(False)
    else:
        _attend(False)

    @pl.when(ki == nk - 1)
    def _finalize():
        inv_l = pl.reciprocal(l_sc[...], approx=True)       # EUP slot
        o_ref[0] = (acc_sc[...] * inv_l).astype(o_ref.dtype)


# ---------------------------------------------------------------------------
# Wrapper
# ---------------------------------------------------------------------------
def masked_self_attention(x, w_attn, b_attn, w_proj, b_proj,
                          *, n_head, is_causal=True):
    """x: (B, T, C). Weights laid out as (in_features, out_features)."""
    B, T, C = x.shape
    assert C % n_head == 0
    hd = C // n_head
    out_dtype = x.dtype

    # Fold 1/sqrt(hd) into the Q columns of the fused QKV weight/bias (free).
    scale = 1.0 / math.sqrt(hd)
    w_attn_f = w_attn.astype(jnp.float32).at[:, :C].multiply(scale)
    b_attn_f = b_attn.astype(jnp.float32).at[:C].multiply(scale)

    w_attn_b = w_attn_f.astype(jnp.bfloat16)                 # (C, 3C) bf16
    b_attn_2 = b_attn_f.reshape(1, 3 * C)                    # (1, 3C) f32
    w_proj_b = w_proj.astype(jnp.bfloat16)                   # (C, C)  bf16
    b_proj_2 = b_proj.astype(jnp.float32).reshape(1, C)      # (1, C)  f32

    # Pad T to a multiple of 128: lane-dense, MXU-shaped tiles on every
    # generation instead of the tiny-tile fallback.
    T_pad = _round_up(T, _LANE)
    x_p = x if T_pad == T else jnp.pad(x, ((0, 0), (0, T_pad - T), (0, 0)))

    rows = B * T_pad
    x2 = x_p.astype(jnp.bfloat16).reshape(rows, C)

    # ---- 1) fused QKV projection: (M, N, K)-tiled GEMM ----
    qkv = _gemm_bias(x2, w_attn_b, b_attn_2, jnp.bfloat16)   # (rows, 3C) bf16

    # Layout plumbing (XLA-side): per-head Q / K^T / V slabs + ones column on V.
    qkv5 = qkv.reshape(B, T_pad, 3, n_head, hd)
    q_bh = qkv5[:, :, 0].transpose(0, 2, 1, 3).reshape(B * n_head, T_pad, hd)
    k_t = qkv5[:, :, 1].transpose(0, 2, 3, 1).reshape(B * n_head, hd, T_pad)
    v_bh = qkv5[:, :, 2].transpose(0, 2, 1, 3).reshape(B * n_head, T_pad, hd)
    ones = jnp.ones((B * n_head, T_pad, 1), jnp.bfloat16)
    v_ext = jnp.concatenate([v_bh, ones], axis=-1)           # (B*H, T_pad, hd+1)

    # ---- 2) flash attention (online softmax), heads on the grid ----
    tq = 256 if (T_pad % 256 == 0) else 128
    tk = tq                                 # K/V DMA-skip clamp requires tq == tk
    n_q = T_pad // tq
    n_kv = T_pad // tk
    exp_dtype = _exp_dtype_for_device()

    kernel = functools.partial(
        _flash_attn_kernel, tq=tq, tk=tk, hd=hd, t_valid=T,
        is_causal=is_causal, padded=(T_pad != T), exp_dtype=exp_dtype)

    if is_causal:
        # Causally-dead KV tiles (ki > qi): clamp the block index so Pallas
        # skips the K/V HBM fetch entirely (compute is skipped via pl.when).
        kv_idx = lambda bh, qi, ki: (bh, jnp.minimum(ki, qi), 0)
        kvT_idx = lambda bh, qi, ki: (bh, 0, jnp.minimum(ki, qi))
    else:
        kv_idx = lambda bh, qi, ki: (bh, ki, 0)
        kvT_idx = lambda bh, qi, ki: (bh, 0, ki)

    attn_est = (2 * (tq * hd + hd * tk + tk * (hd + 1)) * 2   # q, k^T, v (bf16, 2-buf)
                + (tq * (hd + 2)) * 4                         # m/l/acc f32 scratch
                + 2 * tq * hd * 2)                            # out (bf16, 2-buf)

    y_bh = pl.pallas_call(
        kernel,
        out_shape=jax.ShapeDtypeStruct((B * n_head, T_pad, hd), jnp.bfloat16),
        grid_spec=pltpu.PrefetchScalarGridSpec(
            num_scalar_prefetch=0,
            grid=(B * n_head, n_q, n_kv),
            in_specs=[
                pl.BlockSpec((1, tq, hd), lambda bh, qi, ki: (bh, qi, 0)),   # q
                pl.BlockSpec((1, hd, tk), kvT_idx),                          # k^T
                pl.BlockSpec((1, tk, hd + 1), kv_idx),                       # [v | 1]
            ],
            out_specs=pl.BlockSpec((1, tq, hd), lambda bh, qi, ki: (bh, qi, 0)),
            scratch_shapes=[
                pltpu.VMEM((tq, 1), jnp.float32),     # running row max
                pltpu.VMEM((tq, 1), jnp.float32),     # running row sum
                pltpu.VMEM((tq, hd), jnp.float32),    # output accumulator
            ],
        ),
        compiler_params=pltpu.CompilerParams(
            dimension_semantics=("parallel", "parallel", "arbitrary"),
            vmem_limit_bytes=_vmem_limit(attn_est)),
    )(q_bh, k_t, v_ext)

    # ---- 3) output projection: standalone tiled GEMM ----
    y2 = (y_bh.reshape(B, n_head, T_pad, hd)
              .transpose(0, 2, 1, 3)
              .reshape(rows, C))
    out2 = _gemm_bias(y2, w_proj_b, b_proj_2, out_dtype)      # (rows, C)
    out = out2.reshape(B, T_pad, C)
    return out[:, :T, :] if T_pad != T else out


def _reference(x, w_attn, b_attn, w_proj, b_proj, *, n_head, is_causal=True):
    """Pure-JAX f32 reference mirroring the PyTorch forward (eval mode)."""
    B, T, C = x.shape
    hd = C // n_head
    qkv = x @ w_attn + b_attn                       # (B, T, 3C)
    q, k, v = jnp.split(qkv, 3, axis=-1)

    def to_heads(t):
        return jnp.transpose(t.reshape(B, T, n_head, hd), (0, 2, 1, 3))

    q, k, v = to_heads(q), to_heads(k), to_heads(v)
    att = jnp.einsum('bhtd,bhsd->bhts', q, k) / math.sqrt(hd)
    if is_causal:
        mask = jnp.tril(jnp.ones((T, T), dtype=bool))
        att = jnp.where(mask[None, None], att, -jnp.inf)
    att = jax.nn.softmax(att, axis=-1)
    y = jnp.einsum('bhts,bhsd->bhtd', att, v)
    y = jnp.transpose(y, (0, 2, 1, 3)).reshape(B, T, C)
    return y @ w_proj + b_proj


if __name__ == "__main__":
    # Small config: n_embd=32, n_head=4, T=8, bias=True, causal, eval mode.
    B, T, C, n_head = 2, 8, 32, 4

    key = jax.random.PRNGKey(0)
    kx, k1, k2, k3, k4 = jax.random.split(key, 5)

    x = jax.random.normal(kx, (B, T, C), dtype=jnp.float32)

    # Parameters stored as (in_features, out_features) so the kernels do x @ W
    # (transpose of torch nn.Linear's (out, in) weight).
    w_attn = 0.02 * jax.random.normal(k1, (C, 3 * C), dtype=jnp.float32)
    b_attn = 0.02 * jax.random.normal(k2, (3 * C,), dtype=jnp.float32)
    w_proj = 0.02 * jax.random.normal(k3, (C, C), dtype=jnp.float32)
    b_proj = 0.02 * jax.random.normal(k4, (C,), dtype=jnp.float32)

    y = masked_self_attention(x, w_attn, b_attn, w_proj, b_proj,
                              n_head=n_head, is_causal=True)
    y = jax.block_until_ready(y)

    y_ref = _reference(x, w_attn, b_attn, w_proj, b_proj,
                       n_head=n_head, is_causal=True)
    assert y.shape == (B, T, C)
    max_err = float(jnp.max(jnp.abs(y - y_ref)))
    assert jnp.allclose(y, y_ref, atol=2e-2, rtol=2e-2), \
        f"mismatch vs reference (max abs err {max_err})"

    print("KERNEL_OK")
</pallas_src>

<mosaic_0001>
module attributes {stable_mosaic.version = 11 : i64} {
  func.func @_gemm_bias_kernel(%arg0: i32, %arg1: i32, %arg2: i32, %arg3: memref<256x32xbf16, #tpu.memory_space<vmem>>, %arg4: memref<32x96xbf16, #tpu.memory_space<vmem>>, %arg5: memref<1x96xf32, #tpu.memory_space<vmem>>, %arg6: memref<256x96xbf16, #tpu.memory_space<vmem>>, %arg7: memref<256x96xf32, #tpu.memory_space<vmem>>) attributes {dimension_semantics = [#tpu.dimension_semantics<parallel>, #tpu.dimension_semantics<parallel>, #tpu.dimension_semantics<arbitrary>], iteration_bounds = array<i64: 1, 1, 1>, scalar_prefetch = 0 : i64, scratch_operands = 1 : i64, tpu.core_type = #tpu.core_type<tc>, window_params = [{transform_indices = @transform_0, window_bounds = array<i64: 256, 32>}, {transform_indices = @transform_1, window_bounds = array<i64: 32, 96>}, {transform_indices = @transform_2, window_bounds = array<i64: 1, 96>}, {transform_indices = @transform_3, window_bounds = array<i64: 256, 96>}]} {
    %c0_i32 = arith.constant 0 : i32
    %0 = arith.cmpi eq, %arg2, %c0_i32 : i32
    %1 = arith.extui %0 : i1 to i32
    %c0_i32_0 = arith.constant 0 : i32
    %2 = arith.cmpi ne, %1, %c0_i32_0 : i32
    scf.if %2 {
      %cst_10 = arith.constant 0.000000e+00 : f32
      %12 = vector.broadcast %cst_10 : f32 to vector<256x96xf32>
      %c0_11 = arith.constant 0 : index
      %c0_12 = arith.constant 0 : index
      %13 = vector.load %arg7[%c0_11, %c0_12] : memref<256x96xf32, #tpu.memory_space<vmem>>, vector<256x96xf32>
      tpu.vector_store %arg7[%c0_11, %c0_12], %12 {strides = array<i32>} : memref<256x96xf32, #tpu.memory_space<vmem>>, vector<256x96xf32>,
    } else {
    }
    %c0 = arith.constant 0 : index
    %c0_1 = arith.constant 0 : index
    %3 = vector.load %arg7[%c0, %c0_1] : memref<256x96xf32, #tpu.memory_space<vmem>>, vector<256x96xf32>
    %c0_2 = arith.constant 0 : index
    %c0_3 = arith.constant 0 : index
    %4 = vector.load %arg3[%c0_2, %c0_3] : memref<256x32xbf16, #tpu.memory_space<vmem>>, vector<256x32xbf16>
    %c0_4 = arith.constant 0 : index
    %c0_5 = arith.constant 0 : index
    %5 = vector.load %arg4[%c0_4, %c0_5] : memref<32x96xbf16, #tpu.memory_space<vmem>>, vector<32x96xbf16>
    %cst = arith.constant dense<0.000000e+00> : vector<256x96xf32>
    %6 = tpu.matmul %4, %5, %cst {dimension_numbers = #tpu.dot_dimension_numbers<[1], [0], [0], [1], [0, 0, 1, 1], [], []>} : vector<256x32xbf16>, vector<32x96xbf16>, vector<256x96xf32> -> vector<256x96xf32>
    %7 = arith.addf %3, %6 : vector<256x96xf32>
    %c0_6 = arith.constant 0 : index
    %c0_7 = arith.constant 0 : index
    %8 = vector.load %arg7[%c0_6, %c0_7] : memref<256x96xf32, #tpu.memory_space<vmem>>, vector<256x96xf32>
    tpu.vector_store %arg7[%c0_6, %c0_7], %7 {strides = array<i32>} : memref<256x96xf32, #tpu.memory_space<vmem>>, vector<256x96xf32>,
    %c0_i32_8 = arith.constant 0 : i32
    %9 = arith.cmpi eq, %arg2, %c0_i32_8 : i32
    %10 = arith.extui %9 : i1 to i32
    %c0_i32_9 = arith.constant 0 : i32
    %11 = arith.cmpi ne, %10, %c0_i32_9 : i32
    scf.if %11 {
      %c0_10 = arith.constant 0 : index
      %c0_11 = arith.constant 0 : index
      %12 = vector.load %arg7[%c0_10, %c0_11] : memref<256x96xf32, #tpu.memory_space<vmem>>, vector<256x96xf32>
      %c0_12 = arith.constant 0 : index
      %c0_13 = arith.constant 0 : index
      %13 = vector.load %arg5[%c0_12, %c0_13] : memref<1x96xf32, #tpu.memory_space<vmem>>, vector<1x96xf32>
      %14 = vector.broadcast %13 : vector<1x96xf32> to vector<256x96xf32>
      %15 = arith.addf %12, %14 : vector<256x96xf32>
      %16 = arith.truncf %15 : vector<256x96xf32> to vector<256x96xbf16>
      %c0_14 = arith.constant 0 : index
      %c0_15 = arith.constant 0 : index
      %17 = vector.load %arg6[%c0_14, %c0_15] : memref<256x96xbf16, #tpu.memory_space<vmem>>, vector<256x96xbf16>
      tpu.vector_store %arg6[%c0_14, %c0_15], %16 {strides = array<i32>} : memref<256x96xbf16, #tpu.memory_space<vmem>>, vector<256x96xbf16>,
    } else {
    }
    return
  }
  func.func @transform_0(%arg0: i32, %arg1: i32, %arg2: i32) -> (i32, i32) {
    %c0_i32 = arith.constant 0 : i32
    return %arg0, %arg2 : i32, i32
  }
  func.func @transform_1(%arg0: i32, %arg1: i32, %arg2: i32) -> (i32, i32) {
    %c0_i32 = arith.constant 0 : i32
    return %arg2, %arg1 : i32, i32
  }
  func.func @transform_2(%arg0: i32, %arg1: i32, %arg2: i32) -> (i32, i32) {
    %c0_i32 = arith.constant 0 : i32
    %c0_i32_0 = arith.constant 0 : i32
    return %c0_i32, %arg1 : i32, i32
  }
  func.func @transform_3(%arg0: i32, %arg1: i32, %arg2: i32) -> (i32, i32) {
    %c0_i32 = arith.constant 0 : i32
    return %arg0, %arg1 : i32, i32
  }
}

</mosaic_0001>

<bundles_post_ra>
// kernel: tpu_custom_call.1
= control target key start
LH: loop header
LB: loop body
LE: loop exit
PB: predicated region body
PF: predicated region fallthrough
CT: control target
= control target key end

     0   :  { %vm19_vm0 = vcmask 785408   ;;  %v902_v1 = vmov 0.0   ;;  %vm212_vm1 = vcmask 261120   ;;  %vm689_vm2 = vcmask 781312   ;;  %s1222_s1 = inlined_call_operand.vmem [shape: bf16[32,96], index: 1, kind: input, shape index: {}]   ;;  %s1223_s0 = inlined_call_operand.vmem [shape: bf16[256,32], index: 0, kind: input, shape index: {}]   ;;  %s1224_s2 = inlined_call_operand.vmem [shape: f32[1,96], index: 2, kind: input, shape index: {}]   ;;  %s1225_s3 = inlined_call_operand.vmem [shape: bf16[256,96], index: 3, kind: output, shape index: {}]  }
   0x1   :  { %v884_v0 = vld [vmem:[%s1222_s1] sm:$0xff]   ;;  %22 = vst.msk [vmem:[#allocation2 + $0x10] sm:$0xff] %vm19_vm0, %v902_v1  ;;  %20 = vst.msk [vmem:[#allocation2] sm:$0xff] %vm19_vm0, %v902_v1  ;;  %v885_v2 = vld [vmem:[%s1222_s1 + $0x8] sm:$0xff]  }
   0x2   :  { %21 = vst.msk [vmem:[#allocation2 + $0x8] sm:$0xff] %vm19_vm0, %v902_v1  ;;  %23 = vst.msk [vmem:[#allocation2 + $0x18] sm:$0xff] %vm19_vm0, %v902_v1  ;;  %843 = vmatprep.subr.bf16.mxu0 %v884_v0  ;;  %879 = vmatprep.subr.bf16.mxu1 %v884_v0  ;;  %v886_v3 = vld [vmem:[%s1223_s0] sm:$0xff]   ;;  %v888_v5 = vld [vmem:[%s1223_s0 + $0x8] sm:$0xff]  }
   0x3   :  { %24 = vst.msk [vmem:[#allocation2 + $0x20] sm:$0xff] %vm19_vm0, %v902_v1  ;;  %25 = vst.msk [vmem:[#allocation2 + $0x28] sm:$0xff] %vm19_vm0, %v902_v1  ;;  %844 = vmatpush3.bf16.msra.mxu0 %v884_v0  ;;  %881 = vmatpush3.bf16.msra.mxu1 %v884_v0  ;;  %v887_v4 = vld [vmem:[%s1223_s0 + $0x40] sm:$0xff]   ;;  %v889_v6 = vld [vmem:[%s1223_s0 + $0x48] sm:$0xff]  }
   0x4   :  { %26 = vst.msk [vmem:[#allocation2 + $0x30] sm:$0xff] %vm19_vm0, %v902_v1  ;;  %27 = vst.msk [vmem:[#allocation2 + $0x38] sm:$0xff] %vm19_vm0, %v902_v1  ;;  %845 = vmatprep.subr.bf16.mxu0 %v885_v2  ;;  %880 = vmatprep.subr.bf16.mxu1 %v885_v2  ;;  %v890_v7 = vld [vmem:[%s1223_s0 + $0x10] sm:$0xff]   ;;  %v892_v9 = vld [vmem:[%s1223_s0 + $0x18] sm:$0xff]  }
   0x5   :  { %28 = vst.msk [vmem:[#allocation2 + $0x40] sm:$0xff] %vm19_vm0, %v902_v1  ;;  %29 = vst.msk [vmem:[#allocation2 + $0x48] sm:$0xff] %vm19_vm0, %v902_v1  ;;  %847 = vmatprep.mubr.msk.bf16.mxu0 %vm212_vm1, %v886_v3  ;;  %863 = vmatprep.mubr.msk.bf16.mxu1 %vm212_vm1, %v887_v4  ;;  %v891_v8 = vld [vmem:[%s1223_s0 + $0x50] sm:$0xff]   ;;  %v893_v10 = vld [vmem:[%s1223_s0 + $0x58] sm:$0xff]  }
   0x6   :  { %30 = vst.msk [vmem:[#allocation2 + $0x50] sm:$0xff] %vm19_vm0, %v902_v1  ;;  %31 = vst.msk [vmem:[#allocation2 + $0x58] sm:$0xff] %vm19_vm0, %v902_v1  ;;  %v894_v11 = vld [vmem:[%s1223_s0 + $0x20] sm:$0xff]   ;;  %v896_v13 = vld [vmem:[%s1223_s0 + $0x28] sm:$0xff]  }
   0x7   :  { %32 = vst.msk [vmem:[#allocation2 + $0x60] sm:$0xff] %vm19_vm0, %v902_v1  ;;  %33 = vst.msk [vmem:[#allocation2 + $0x68] sm:$0xff] %vm19_vm0, %v902_v1  ;;  %846 = vmatpush3.bf16.msra.mxu0 %v885_v2  ;;  %882 = vmatpush3.bf16.msra.mxu1 %v885_v2  ;;  %v895_v12 = vld [vmem:[%s1223_s0 + $0x60] sm:$0xff]   ;;  %v897_v14 = vld [vmem:[%s1223_s0 + $0x68] sm:$0xff]  }
   0x8   :  { %34 = vst.msk [vmem:[#allocation2 + $0x70] sm:$0xff] %vm19_vm0, %v902_v1  ;;  %35 = vst.msk [vmem:[#allocation2 + $0x78] sm:$0xff] %vm19_vm0, %v902_v1  ;;  %v898_v15 = vld [vmem:[%s1223_s0 + $0x30] sm:$0xff]   ;;  %v900_v17 = vld [vmem:[%s1223_s0 + $0x38] sm:$0xff]  }
   0x9   :  { %36 = vst.msk [vmem:[#allocation2 + $0x80] sm:$0xff] %vm19_vm0, %v902_v1  ;;  %37 = vst.msk [vmem:[#allocation2 + $0x88] sm:$0xff] %vm19_vm0, %v902_v1  ;;  %v899_v16 = vld [vmem:[%s1223_s0 + $0x70] sm:$0xff]   ;;  %v901_v18 = vld [vmem:[%s1223_s0 + $0x78] sm:$0xff]  }
   0xa   :  { %38 = vst.msk [vmem:[#allocation2 + $0x90] sm:$0xff] %vm19_vm0, %v902_v1  ;;  %39 = vst.msk [vmem:[#allocation2 + $0x98] sm:$0xff] %vm19_vm0, %v902_v1  ;;  %848 = vmatmul.mubr.msk.bf16.vlgmr.msra.gmra.mrb[0].mxu0 %vm212_vm1, %v888_v5  ;;  %864 = vmatmul.mubr.msk.bf16.vlgmr.msra.gmra.mrb[0].mxu1 %vm212_vm1, %v889_v6  ;;  %v54_v19 = vld [vmem:[#allocation2 + $0x10] sm:$0xff]  ;;  %v52_v21 = vld [vmem:[#allocation2] sm:$0xff] }
   0xb   :  { %40 = vst.msk [vmem:[#allocation2 + $0xa0] sm:$0xff] %vm19_vm0, %v902_v1  ;;  %41 = vst.msk [vmem:[#allocation2 + $0xa8] sm:$0xff] %vm19_vm0, %v902_v1  ;;  %851 = vmatprep.mubr.msk.bf16.mxu0 %vm212_vm1, %v890_v7  ;;  %867 = vmatprep.mubr.msk.bf16.mxu1 %vm212_vm1, %v891_v8  ;;  %v55_v25 = vld [vmem:[#allocation2 + $0x18] sm:$0xff]  ;;  %v53_v31 = vld [vmem:[#allocation2 + $0x8] sm:$0xff] }
   0xc   :  { %42 = vst.msk [vmem:[#allocation2 + $0xb0] sm:$0xff] %vm19_vm0, %v902_v1  ;;  %43 = vst.msk [vmem:[#allocation2 + $0xb8] sm:$0xff] %vm19_vm0, %v902_v1  ;;  %v58_v43 = vld [vmem:[#allocation2 + $0x30] sm:$0xff]  ;;  %v56_v45 = vld [vmem:[#allocation2 + $0x20] sm:$0xff] }
   0xd   :  { %44 = vst.msk [vmem:[#allocation2 + $0xc0] sm:$0xff] %vm19_vm0, %v902_v1  ;;  %45 = vst.msk [vmem:[#allocation2 + $0xc8] sm:$0xff] %vm19_vm0, %v902_v1  ;;  %v1036_v47 = vld [vmem:[%s1224_s2] ss:$0 sm:$0xff]  ;;  %v59_v50 = vld [vmem:[#allocation2 + $0x38] sm:$0xff] }
   0xe   :  { %46 = vst.msk [vmem:[#allocation2 + $0xd0] sm:$0xff] %vm19_vm0, %v902_v1  ;;  %47 = vst.msk [vmem:[#allocation2 + $0xd8] sm:$0xff] %vm19_vm0, %v902_v1  ;;  %v57_v56 = vld [vmem:[#allocation2 + $0x28] sm:$0xff] }
   0xf   :  { %48 = vst.msk [vmem:[#allocation2 + $0xe0] sm:$0xff] %vm19_vm0, %v902_v1  ;;  %49 = vst.msk [vmem:[#allocation2 + $0xe8] sm:$0xff] %vm19_vm0, %v902_v1 }
  0x10   :  { %50 = vst.msk [vmem:[#allocation2 + $0xf0] sm:$0xff] %vm19_vm0, %v902_v1  ;;  %51 = vst.msk [vmem:[#allocation2 + $0xf8] sm:$0xff] %vm19_vm0, %v902_v1  ;;  %v68_v22 = vld [vmem:[#allocation2 + $0x80] sm:$0xff]  ;;  %v69_v32 = vld [vmem:[#allocation2 + $0x88] sm:$0xff] }
  0x11   :  { %v70_v20 = vld [vmem:[#allocation2 + $0x90] sm:$0xff]  ;;  %v71_v26 = vld [vmem:[#allocation2 + $0x98] sm:$0xff] }
  0x12   :  { %852 = vmatmul.mubr.msk.bf16.gmra.mrb[4].mxu0 %vm212_vm1, %v892_v9  ;;  %868 = vmatmul.mubr.msk.bf16.gmra.mrb[4].mxu1 %vm212_vm1, %v893_v10  ;;  %v72_v46 = vld [vmem:[#allocation2 + $0xa0] sm:$0xff]  ;;  %v73_v57 = vld [vmem:[#allocation2 + $0xa8] sm:$0xff] }
  0x13   :  { %855 = vmatprep.mubr.msk.bf16.mxu0 %vm212_vm1, %v894_v11  ;;  %871 = vmatprep.mubr.msk.bf16.mxu1 %vm212_vm1, %v895_v12  ;;  %v74_v44 = vld [vmem:[#allocation2 + $0xb0] sm:$0xff]  ;;  %v75_v51 = vld [vmem:[#allocation2 + $0xb8] sm:$0xff] }
  0x1a   :  { %856 = vmatmul.mubr.msk.bf16.gmra.mrb[8].mxu0 %vm212_vm1, %v896_v13  ;;  %872 = vmatmul.mubr.msk.bf16.gmra.mrb[8].mxu1 %vm212_vm1, %v897_v14 }
  0x1b   :  { %859 = vmatprep.mubr.msk.bf16.mxu0 %vm212_vm1, %v898_v15  ;;  %875 = vmatprep.mubr.msk.bf16.mxu1 %vm212_vm1, %v899_v16 }
  0x22   :  { %860 = vmatmul.mubr.msk.bf16.gmra.mrb[12].mxu0 %vm212_vm1, %v900_v17  ;;  %876 = vmatmul.mubr.msk.bf16.gmra.mrb[12].mxu1 %vm212_vm1, %v901_v18 }
  0xdd   :  { %v849_v23 = vpop.f32.mrb[0].mxu0  ;;  %v865_v24 = vpop.f32.mrb[0].mxu1 }
  0xde   :  { %v424_v27 = vadd.f32 %v849_v23, %v54_v19  ;;  %v440_v28 = vadd.f32 %v865_v24, %v70_v20  ;;  %v295_v29 = vpop.f32.mrb[1].mxu0  ;;  %v359_v30 = vpop.f32.mrb[1].mxu1  ;;  %v62_v24 = vld [vmem:[#allocation2 + $0x50] sm:$0xff] }
  0xdf   :  { %v422_v33 = vadd.f32 %v295_v29, %v52_v21  ;;  %v438_v34 = vadd.f32 %v359_v30, %v68_v22  ;;  %v850_v35 = vpop.f32.mrb[2].mxu0  ;;  %v866_v36 = vpop.f32.mrb[2].mxu1  ;;  %v76_v29 = vld [vmem:[#allocation2 + $0xc0] sm:$0xff] }
  0xe0   :  { %457 = vst.msk [vmem:[#allocation2 + $0x10] sm:$0xff] %vm19_vm0, %v424_v27  ;;  %473 = vst.msk [vmem:[#allocation2 + $0x90] sm:$0xff] %vm19_vm0, %v440_v28  ;;  %v425_v37 = vadd.f32 %v850_v35, %v55_v25  ;;  %v441_v38 = vadd.f32 %v866_v36, %v71_v26  ;;  %v298_v39 = vpop.f32.mrb[3].mxu0  ;;  %v362_v40 = vpop.f32.mrb[3].mxu1  ;;  %v78_v25 = vld [vmem:[#allocation2 + $0xd0] sm:$0xff]  ;;  %v60_v28 = vld [vmem:[#allocation2 + $0x40] sm:$0xff] }
  0xe1   :  { %455 = vst.msk [vmem:[#allocation2] sm:$0xff] %vm19_vm0, %v422_v33  ;;  %471 = vst.msk [vmem:[#allocation2 + $0x80] sm:$0xff] %vm19_vm0, %v438_v34  ;;  %v423_v41 = vadd.f32 %v298_v39, %v53_v31  ;;  %v439_v42 = vadd.f32 %v362_v40, %v69_v32  ;;  %v63_v34 = vld [vmem:[#allocation2 + $0x58] sm:$0xff]  ;;  %v61_v40 = vld [vmem:[#allocation2 + $0x48] sm:$0xff] }
  0xe2   :  { %458 = vst.msk [vmem:[#allocation2 + $0x18] sm:$0xff] %vm19_vm0, %v425_v37  ;;  %474 = vst.msk [vmem:[#allocation2 + $0x98] sm:$0xff] %vm19_vm0, %v441_v38  ;;  %v79_v35 = vld [vmem:[#allocation2 + $0xd8] sm:$0xff] }
  0xe3   :  { %456 = vst.msk [vmem:[#allocation2 + $0x8] sm:$0xff] %vm19_vm0, %v423_v41  ;;  %472 = vst.msk [vmem:[#allocation2 + $0x88] sm:$0xff] %vm19_vm0, %v439_v42  ;;  %v77_v41 = vld [vmem:[#allocation2 + $0xc8] sm:$0xff] }
  0xe5   :  { %v853_v48 = vpop.f32.mrb[4].mxu0  ;;  %v869_v49 = vpop.f32.mrb[4].mxu1 }
  0xe6   :  { %v428_v52 = vadd.f32 %v853_v48, %v58_v43  ;;  %v444_v53 = vadd.f32 %v869_v49, %v74_v44  ;;  %v311_v54 = vpop.f32.mrb[5].mxu0  ;;  %v375_v55 = vpop.f32.mrb[5].mxu1 }
  0xe7   :  { %v492_v58 = vld [vmem:[#allocation2 + $0x10] sm:$0xff]  ;;  %v426_v60 = vadd.f32 %v311_v54, %v56_v45  ;;  %v442_v61 = vadd.f32 %v375_v55, %v72_v46  ;;  %v854_v62 = vpop.f32.mrb[6].mxu0  ;;  %v870_v63 = vpop.f32.mrb[6].mxu1 }
  0xe8   :  { %v508_v59 = vld [vmem:[#allocation2 + $0x90] sm:$0xff]  ;;  %v531_v0 = vadd.f32 %v1036_v47, %v492_v58  ;;  %v490_v2 = vld [vmem:[#allocation2] sm:$0xff]  ;;  %461 = vst.msk [vmem:[#allocation2 + $0x30] sm:$0xff] %vm19_vm0, %v428_v52  ;;  %477 = vst.msk [vmem:[#allocation2 + $0xb0] sm:$0xff] %vm19_vm0, %v444_v53  ;;  %v429_v4 = vadd.f32 %v854_v62, %v59_v50  ;;  %v445_v5 = vadd.f32 %v870_v63, %v75_v51  ;;  %v314_v6 = vpop.f32.mrb[7].mxu0  ;;  %v378_v7 = vpop.f32.mrb[7].mxu1 }
  0xe9   :  { %v547_v1 = vadd.f32 %v1036_v47, %v508_v59  ;;  %v506_v3 = vld [vmem:[#allocation2 + $0x80] sm:$0xff]  ;;  %v529_v8 = vadd.f32 %v1036_v47, %v490_v2  ;;  %v493_v10 = vld [vmem:[#allocation2 + $0x18] sm:$0xff]  ;;  %459 = vst.msk [vmem:[#allocation2 + $0x20] sm:$0xff] %vm19_vm0, %v426_v60  ;;  %475 = vst.msk [vmem:[#allocation2 + $0xa0] sm:$0xff] %vm19_vm0, %v442_v61  ;;  %v427_v12 = vadd.f32 %v314_v6, %v57_v56 }
  0xea   :  { %v545_v9 = vadd.f32 %v1036_v47, %v506_v3  ;;  %v509_v11 = vld [vmem:[#allocation2 + $0x98] sm:$0xff]  ;;  %v443_v13 = vadd.f32 %v378_v7, %v73_v57  ;;  %v795_v14 = vpack.c.bf16 %v531_v0, %v531_v0  ;;  %v532_v16 = vadd.f32 %v1036_v47, %v493_v10  ;;  %v491_v18 = vld [vmem:[#allocation2 + $0x8] sm:$0xff]  ;;  %462 = vst.msk [vmem:[#allocation2 + $0x38] sm:$0xff] %vm19_vm0, %v429_v4  ;;  %v82_v10 = vld [vmem:[#allocation2 + $0xf0] sm:$0xff] }
  0xeb   :  { %v811_v15 = vpack.c.bf16 %v547_v1, %v547_v1  ;;  %v548_v17 = vadd.f32 %v1036_v47, %v509_v11  ;;  %v507_v19 = vld [vmem:[#allocation2 + $0x88] sm:$0xff]  ;;  %478 = vst.msk [vmem:[#allocation2 + $0xb8] sm:$0xff] %vm19_vm0, %v445_v5  ;;  %v793_v20 = vpack.c.bf16 %v529_v8, %v529_v8  ;;  %v530_v22 = vadd.f32 %v1036_v47, %v491_v18 }
  0xec   :  { %v809_v21 = vpack.c.bf16 %v545_v9, %v545_v9  ;;  %v546_v23 = vadd.f32 %v1036_v47, %v507_v19  ;;  %460 = vst.msk [vmem:[#allocation2 + $0x28] sm:$0xff] %vm19_vm0, %v427_v12  ;;  %476 = vst.msk [vmem:[#allocation2 + $0xa8] sm:$0xff] %vm19_vm0, %v443_v13  ;;  %v796_v26 = vpack.c.bf16 %v532_v16, %v532_v16  ;;  %v66_v9 = vld [vmem:[#allocation2 + $0x70] sm:$0xff]  ;;  %v64_v13 = vld [vmem:[#allocation2 + $0x60] sm:$0xff] }
  0xed   :  { %692 = vst.msk [vmem:[%s1225_s3 + $0x8] sm:$0xf] %vm689_vm2, %v795_v14  ;;  %708 = vst.msk [vmem:[%s1225_s3 + $0x48] sm:$0xf] %vm689_vm2, %v811_v15  ;;  %v812_v27 = vpack.c.bf16 %v548_v17, %v548_v17  ;;  %v794_v30 = vpack.c.bf16 %v530_v22, %v530_v22  ;;  %v857_v32 = vpop.f32.mrb[8].mxu0  ;;  %v873_v33 = vpop.f32.mrb[8].mxu1 }
  0xee   :  { %690 = vst.msk [vmem:[%s1225_s3] sm:$0xf] %vm689_vm2, %v793_v20  ;;  %706 = vst.msk [vmem:[%s1225_s3 + $0x40] sm:$0xf] %vm689_vm2, %v809_v21  ;;  %v810_v31 = vpack.c.bf16 %v546_v23, %v546_v23  ;;  %v432_v36 = vadd.f32 %v857_v32, %v62_v24  ;;  %v448_v37 = vadd.f32 %v873_v33, %v78_v25  ;;  %v327_v38 = vpop.f32.mrb[9].mxu0  ;;  %v391_v39 = vpop.f32.mrb[9].mxu1 }
  0xef   :  { %693 = vst.msk [vmem:[%s1225_s3 + $0xc] sm:$0xf] %vm689_vm2, %v796_v26  ;;  %709 = vst.msk [vmem:[%s1225_s3 + $0x4c] sm:$0xf] %vm689_vm2, %v812_v27  ;;  %v496_v42 = vld [vmem:[#allocation2 + $0x30] sm:$0xff]  ;;  %v430_v44 = vadd.f32 %v327_v38, %v60_v28  ;;  %v446_v45 = vadd.f32 %v391_v39, %v76_v29  ;;  %v858_v46 = vpop.f32.mrb[10].mxu0 }
  0xf0   :  { %691 = vst.msk [vmem:[%s1225_s3 + $0x4] sm:$0xf] %vm689_vm2, %v794_v30  ;;  %707 = vst.msk [vmem:[%s1225_s3 + $0x44] sm:$0xf] %vm689_vm2, %v810_v31  ;;  %v512_v43 = vld [vmem:[#allocation2 + $0xb0] sm:$0xff]  ;;  %v874_v48 = vpop.f32.mrb[10].mxu1  ;;  %v535_v49 = vadd.f32 %v1036_v47, %v496_v42  ;;  %v433_v53 = vadd.f32 %v858_v46, %v63_v34 }
  0xf1   :  { %v551_v50 = vadd.f32 %v1036_v47, %v512_v43  ;;  %v494_v51 = vld [vmem:[#allocation2 + $0x20] sm:$0xff]  ;;  %465 = vst.msk [vmem:[#allocation2 + $0x50] sm:$0xff] %vm19_vm0, %v432_v36  ;;  %481 = vst.msk [vmem:[#allocation2 + $0xd0] sm:$0xff] %vm19_vm0, %v448_v37  ;;  %v449_v54 = vadd.f32 %v874_v48, %v79_v35  ;;  %v330_v55 = vpop.f32.mrb[11].mxu0  ;;  %v394_v56 = vpop.f32.mrb[11].mxu1  ;;  %v497_v59 = vld [vmem:[#allocation2 + $0x38] sm:$0xff] }
  0xf2   :  { %v510_v52 = vld [vmem:[#allocation2 + $0xa0] sm:$0xff]  ;;  %v533_v57 = vadd.f32 %v1036_v47, %v494_v51  ;;  %v513_v60 = vld [vmem:[#allocation2 + $0xb8] sm:$0xff]  ;;  %463 = vst.msk [vmem:[#allocation2 + $0x40] sm:$0xff] %vm19_vm0, %v430_v44  ;;  %479 = vst.msk [vmem:[#allocation2 + $0xc0] sm:$0xff] %vm19_vm0, %v446_v45  ;;  %v431_v61 = vadd.f32 %v330_v55, %v61_v40  ;;  %v447_v62 = vadd.f32 %v394_v56, %v77_v41 }
  0xf3   :  { %v549_v58 = vadd.f32 %v1036_v47, %v510_v52  ;;  %v799_v63 = vpack.c.bf16 %v535_v49, %v535_v49  ;;  %v815_v0 = vpack.c.bf16 %v551_v50, %v551_v50  ;;  %v536_v1 = vadd.f32 %v1036_v47, %v497_v59  ;;  %v495_v3 = vld [vmem:[#allocation2 + $0x28] sm:$0xff]  ;;  %466 = vst.msk [vmem:[#allocation2 + $0x58] sm:$0xff] %vm19_vm0, %v433_v53  ;;  %v80_v14 = vld [vmem:[#allocation2 + $0xe0] sm:$0xff]  ;;  %v67_v19 = vld [vmem:[#allocation2 + $0x78] sm:$0xff] }
  0xf4   :  { %v552_v2 = vadd.f32 %v1036_v47, %v513_v60  ;;  %v511_v4 = vld [vmem:[#allocation2 + $0xa8] sm:$0xff]  ;;  %482 = vst.msk [vmem:[#allocation2 + $0xd8] sm:$0xff] %vm19_vm0, %v449_v54  ;;  %v797_v5 = vpack.c.bf16 %v533_v57, %v533_v57  ;;  %v534_v7 = vadd.f32 %v1036_v47, %v495_v3  ;;  %464 = vst.msk [vmem:[#allocation2 + $0x48] sm:$0xff] %vm19_vm0, %v431_v61  ;;  %v83_v20 = vld [vmem:[#allocation2 + $0xf8] sm:$0xff] }
  0xf5   :  { %v813_v6 = vpack.c.bf16 %v549_v58, %v549_v58  ;;  %v550_v8 = vadd.f32 %v1036_v47, %v511_v4  ;;  %480 = vst.msk [vmem:[#allocation2 + $0xc8] sm:$0xff] %vm19_vm0, %v447_v62  ;;  %v800_v11 = vpack.c.bf16 %v536_v1, %v536_v1  ;;  %v861_v17 = vpop.f32.mrb[12].mxu0  ;;  %v877_v18 = vpop.f32.mrb[12].mxu1  ;;  %v65_v25 = vld [vmem:[#allocation2 + $0x68] sm:$0xff] }
  0xf6   :  { %696 = vst.msk [vmem:[%s1225_s3 + $0x18] sm:$0xf] %vm689_vm2, %v799_v63  ;;  %712 = vst.msk [vmem:[%s1225_s3 + $0x58] sm:$0xf] %vm689_vm2, %v815_v0  ;;  %v816_v12 = vpack.c.bf16 %v552_v2, %v552_v2  ;;  %v798_v15 = vpack.c.bf16 %v534_v7, %v534_v7  ;;  %v436_v21 = vadd.f32 %v861_v17, %v66_v9  ;;  %v343_v23 = vpop.f32.mrb[13].mxu0  ;;  %v407_v24 = vpop.f32.mrb[13].mxu1 }
  0xf7   :  { %694 = vst.msk [vmem:[%s1225_s3 + $0x10] sm:$0xf] %vm689_vm2, %v797_v5  ;;  %710 = vst.msk [vmem:[%s1225_s3 + $0x50] sm:$0xf] %vm689_vm2, %v813_v6  ;;  %v814_v16 = vpack.c.bf16 %v550_v8, %v550_v8  ;;  %v452_v22 = vadd.f32 %v877_v18, %v82_v10  ;;  %v81_v26 = vld [vmem:[#allocation2 + $0xe8] sm:$0xff]  ;;  %v434_v29 = vadd.f32 %v343_v23, %v64_v13  ;;  %v862_v31 = vpop.f32.mrb[14].mxu0 }
  0xf8   :  { %697 = vst.msk [vmem:[%s1225_s3 + $0x1c] sm:$0xf] %vm689_vm2, %v800_v11  ;;  %713 = vst.msk [vmem:[%s1225_s3 + $0x5c] sm:$0xf] %vm689_vm2, %v816_v12  ;;  %v500_v27 = vld [vmem:[#allocation2 + $0x50] sm:$0xff]  ;;  %v450_v30 = vadd.f32 %v407_v24, %v80_v14  ;;  %v878_v32 = vpop.f32.mrb[14].mxu1  ;;  %v437_v37 = vadd.f32 %v862_v31, %v67_v19 }
  0xf9   :  { %695 = vst.msk [vmem:[%s1225_s3 + $0x14] sm:$0xf] %vm689_vm2, %v798_v15  ;;  %711 = vst.msk [vmem:[%s1225_s3 + $0x54] sm:$0xf] %vm689_vm2, %v814_v16  ;;  %v516_v28 = vld [vmem:[#allocation2 + $0xd0] sm:$0xff]  ;;  %v539_v33 = vadd.f32 %v1036_v47, %v500_v27  ;;  %v498_v35 = vld [vmem:[#allocation2 + $0x40] sm:$0xff]  ;;  %v453_v38 = vadd.f32 %v878_v32, %v83_v20 }
  0xfa   :  { %v555_v34 = vadd.f32 %v1036_v47, %v516_v28  ;;  %v514_v36 = vld [vmem:[#allocation2 + $0xc0] sm:$0xff]  ;;  %469 = vst.msk [vmem:[#allocation2 + $0x70] sm:$0xff] %vm19_vm0, %v436_v21  ;;  %485 = vst.msk [vmem:[#allocation2 + $0xf0] sm:$0xff] %vm19_vm0, %v452_v22  ;;  %v346_v39 = vpop.f32.mrb[15].mxu0  ;;  %v410_v40 = vpop.f32.mrb[15].mxu1  ;;  %v537_v41 = vadd.f32 %v1036_v47, %v498_v35  ;;  %v501_v43 = vld [vmem:[#allocation2 + $0x58] sm:$0xff] }
  0xfb   :  { %v553_v42 = vadd.f32 %v1036_v47, %v514_v36  ;;  %v517_v44 = vld [vmem:[#allocation2 + $0xd8] sm:$0xff]  ;;  %467 = vst.msk [vmem:[#allocation2 + $0x60] sm:$0xff] %vm19_vm0, %v434_v29  ;;  %483 = vst.msk [vmem:[#allocation2 + $0xe0] sm:$0xff] %vm19_vm0, %v450_v30  ;;  %v435_v45 = vadd.f32 %v346_v39, %v65_v25  ;;  %v451_v46 = vadd.f32 %v410_v40, %v81_v26  ;;  %v499_v52 = vld [vmem:[#allocation2 + $0x48] sm:$0xff] }
  0xfc   :  { %v803_v48 = vpack.c.bf16 %v539_v33, %v539_v33  ;;  %v819_v49 = vpack.c.bf16 %v555_v34, %v555_v34  ;;  %v540_v50 = vadd.f32 %v1036_v47, %v501_v43  ;;  %v556_v51 = vadd.f32 %v1036_v47, %v517_v44  ;;  %v515_v53 = vld [vmem:[#allocation2 + $0xc8] sm:$0xff]  ;;  %470 = vst.msk [vmem:[#allocation2 + $0x78] sm:$0xff] %vm19_vm0, %v437_v37 }
  0xfd   :  { %486 = vst.msk [vmem:[#allocation2 + $0xf8] sm:$0xff] %vm19_vm0, %v453_v38  ;;  %v801_v54 = vpack.c.bf16 %v537_v41, %v537_v41  ;;  %v817_v55 = vpack.c.bf16 %v553_v42, %v553_v42  ;;  %v538_v56 = vadd.f32 %v1036_v47, %v499_v52  ;;  %v554_v57 = vadd.f32 %v1036_v47, %v515_v53 }
  0xfe   :  { %468 = vst.msk [vmem:[#allocation2 + $0x68] sm:$0xff] %vm19_vm0, %v435_v45  ;;  %484 = vst.msk [vmem:[#allocation2 + $0xe8] sm:$0xff] %vm19_vm0, %v451_v46  ;;  %v804_v58 = vpack.c.bf16 %v540_v50, %v540_v50  ;;  %v820_v59 = vpack.c.bf16 %v556_v51, %v556_v51 }
  0xff   :  { %700 = vst.msk [vmem:[%s1225_s3 + $0x28] sm:$0xf] %vm689_vm2, %v803_v48  ;;  %716 = vst.msk [vmem:[%s1225_s3 + $0x68] sm:$0xf] %vm689_vm2, %v819_v49  ;;  %v802_v60 = vpack.c.bf16 %v538_v56, %v538_v56  ;;  %v818_v61 = vpack.c.bf16 %v554_v57, %v554_v57 }
 0x100   :  { %698 = vst.msk [vmem:[%s1225_s3 + $0x20] sm:$0xf] %vm689_vm2, %v801_v54  ;;  %714 = vst.msk [vmem:[%s1225_s3 + $0x60] sm:$0xf] %vm689_vm2, %v817_v55 }
 0x101   :  { %701 = vst.msk [vmem:[%s1225_s3 + $0x2c] sm:$0xf] %vm689_vm2, %v804_v58  ;;  %717 = vst.msk [vmem:[%s1225_s3 + $0x6c] sm:$0xf] %vm689_vm2, %v820_v59  ;;  %v504_v62 = vld [vmem:[#allocation2 + $0x70] sm:$0xff] }
 0x102   :  { %699 = vst.msk [vmem:[%s1225_s3 + $0x24] sm:$0xf] %vm689_vm2, %v802_v60  ;;  %715 = vst.msk [vmem:[%s1225_s3 + $0x64] sm:$0xf] %vm689_vm2, %v818_v61  ;;  %v520_v63 = vld [vmem:[#allocation2 + $0xf0] sm:$0xff]  ;;  %v543_v0 = vadd.f32 %v1036_v47, %v504_v62  ;;  %v502_v2 = vld [vmem:[#allocation2 + $0x60] sm:$0xff] }
 0x103   :  { %v559_v1 = vadd.f32 %v1036_v47, %v520_v63  ;;  %v518_v3 = vld [vmem:[#allocation2 + $0xe0] sm:$0xff]  ;;  %v541_v4 = vadd.f32 %v1036_v47, %v502_v2  ;;  %v505_v6 = vld [vmem:[#allocation2 + $0x78] sm:$0xff] }
 0x104   :  { %v557_v5 = vadd.f32 %v1036_v47, %v518_v3  ;;  %v521_v7 = vld [vmem:[#allocation2 + $0xf8] sm:$0xff]  ;;  %v807_v8 = vpack.c.bf16 %v543_v0, %v543_v0  ;;  %v544_v10 = vadd.f32 %v1036_v47, %v505_v6 }
 0x105   :  { %v823_v9 = vpack.c.bf16 %v559_v1, %v559_v1  ;;  %v560_v11 = vadd.f32 %v1036_v47, %v521_v7  ;;  %v503_v12 = vld [vmem:[#allocation2 + $0x68] sm:$0xff]  ;;  %v805_v14 = vpack.c.bf16 %v541_v4, %v541_v4 }
 0x106   :  { %v519_v13 = vld [vmem:[#allocation2 + $0xe8] sm:$0xff]  ;;  %v821_v15 = vpack.c.bf16 %v557_v5, %v557_v5  ;;  %v542_v16 = vadd.f32 %v1036_v47, %v503_v12  ;;  %704 = vst.msk [vmem:[%s1225_s3 + $0x38] sm:$0xf] %vm689_vm2, %v807_v8  ;;  %v808_v18 = vpack.c.bf16 %v544_v10, %v544_v10 }
 0x107   :  { %v558_v17 = vadd.f32 %v1036_v47, %v519_v13  ;;  %720 = vst.msk [vmem:[%s1225_s3 + $0x78] sm:$0xf] %vm689_vm2, %v823_v9  ;;  %v824_v19 = vpack.c.bf16 %v560_v11, %v560_v11  ;;  %702 = vst.msk [vmem:[%s1225_s3 + $0x30] sm:$0xf] %vm689_vm2, %v805_v14 }
 0x108   :  { %718 = vst.msk [vmem:[%s1225_s3 + $0x70] sm:$0xf] %vm689_vm2, %v821_v15  ;;  %v806_v47 = vpack.c.bf16 %v542_v16, %v542_v16  ;;  %705 = vst.msk [vmem:[%s1225_s3 + $0x3c] sm:$0xf] %vm689_vm2, %v808_v18 }
 0x109   :  { %v822_v20 = vpack.c.bf16 %v558_v17, %v558_v17  ;;  %721 = vst.msk [vmem:[%s1225_s3 + $0x7c] sm:$0xf] %vm689_vm2, %v824_v19 }
 0x10a   :  { %703 = vst.msk [vmem:[%s1225_s3 + $0x34] sm:$0xf] %vm689_vm2, %v806_v47 }
 0x10b   :  { %719 = vst.msk [vmem:[%s1225_s3 + $0x74] sm:$0xf] %vm689_vm2, %v822_v20 }

</bundles_post_ra>
